<compile_context>
chip_gen: v6e
topology: v6e:2x2x1
jax: 0.10.0
libtpu: 0.0.40
codegen_flags: <defaults>
</compile_context>

<pallas_src>
import functools

import jax
import jax.numpy as jnp
from jax import lax
from jax.experimental import pallas as pl
from jax.experimental.pallas import tpu as pltpu

SLAB_WIDTH = 1024        # last dim: 8 * 128 lanes -> unmasked, lane-dense stores
MAX_BLOCK_ROWS = 512     # (512, 1024) f32 block = 2 MiB; x4 (dbl-buf in+out) = 8 MiB


def _dropout_kernel(seed_ref, x_ref, o_ref, *, threshold, scale):
    nrows, ncols = x_ref.shape

    # Global element index of every element in this block (uint32, wraps ok).
    pid_base = (pl.program_id(0) * nrows)
    row = lax.broadcasted_iota(jnp.int32, (nrows, ncols), 0).astype(jnp.uint32)
    col = lax.broadcasted_iota(jnp.int32, (nrows, ncols), 1).astype(jnp.uint32)
    h = (jnp.uint32(pid_base) + row) * jnp.uint32(ncols) + col

    # Mix in the seed (golden-ratio multiply), then murmur3 fmix32 finalizer.
    key = seed_ref[0].astype(jnp.uint32) * jnp.uint32(0x9E3779B9)
    h = h + key
    h = h ^ (h >> 16)
    h = h * jnp.uint32(0x85EBCA6B)
    h = h ^ (h >> 13)
    h = h * jnp.uint32(0xC2B2AE35)
    h = h ^ (h >> 16)

    # Drop with probability `prob`: P(h < threshold) = prob for uniform uint32.
    keep = h >= jnp.uint32(threshold)

    xv = x_ref[...].astype(jnp.float32)
    o_ref[...] = jnp.where(keep, xv * jnp.float32(scale),
                           jnp.float32(0.0)).astype(o_ref.dtype)


def complex_dropout_real_format(x, seed, prob=0.5, training=True):
    """JAX/Pallas equivalent of ComplexDropoutRealFormat.forward."""
    if (not training) or prob <= 0.0:
        return x
    if prob >= 1.0:
        # torch dropout(p=1) zeroes everything; avoid inf scale.
        return jnp.zeros_like(x)

    orig_shape = x.shape
    dtype = x.dtype
    n = x.size
    flat = x.reshape(-1)

    # Pad to a multiple of the slab width (wide, lane-dense last dim).
    pad = (-n) % SLAB_WIDTH
    if pad:
        flat = jnp.pad(flat, (0, pad))
    rows = (n + pad) // SLAB_WIDTH
    x2 = flat.reshape(rows, SLAB_WIDTH)

    # Large lane-dense blocks; single block if the whole slab fits.
    if rows <= MAX_BLOCK_ROWS:
        block_rows = rows
        grid = (1,)
    else:
        block_rows = MAX_BLOCK_ROWS
        grid = (pl.cdiv(rows, block_rows),)

    threshold = min(int(float(prob) * (1 << 32)), (1 << 32) - 1)
    scale = 1.0 / (1.0 - float(prob))
    kernel = functools.partial(_dropout_kernel, threshold=threshold, scale=scale)

    seed_arr = jnp.asarray([seed], dtype=jnp.int32)

    out2 = pl.pallas_call(
        kernel,
        out_shape=jax.ShapeDtypeStruct((rows, SLAB_WIDTH), dtype),
        grid_spec=pltpu.PrefetchScalarGridSpec(
            num_scalar_prefetch=1,
            grid=grid,
            in_specs=[pl.BlockSpec((block_rows, SLAB_WIDTH), lambda i, seed: (i, 0))],
            out_specs=pl.BlockSpec((block_rows, SLAB_WIDTH), lambda i, seed: (i, 0)),
        ),
        compiler_params=pltpu.CompilerParams(
            dimension_semantics=("parallel",),  # stateless hash -> tiles independent
        ),
    )(seed_arr, x2)

    out = out2.reshape(-1)
    if pad:
        out = out[:n]
    return out.reshape(orig_shape)


if __name__ == "__main__":
    key = jax.random.PRNGKey(0)
    # NCHW input, as the PyTorch module would see (batch=2, channels=4, 16x16).
    x = jax.random.normal(key, (2, 4, 16, 16), dtype=jnp.float32)

    prob = 0.5
    y = complex_dropout_real_format(x, seed=1234, prob=prob, training=True)
    y = jax.block_until_ready(y)

    x_np = jax.device_get(x)
    y_np = jax.device_get(y)
    assert y_np.shape == x_np.shape

    # Surviving elements are scaled by 1/(1-p), dropped ones are exactly zero.
    scale = 1.0 / (1.0 - prob)
    safe_x = jnp.where(x_np == 0, 1.0, x_np)
    ratio = y_np / safe_x
    ok_vals = ((abs(ratio) < 1e-6) | (abs(ratio - scale) < 1e-4)).all()
    assert bool(ok_vals), "dropout mask values are not in {0, 1/(1-p)}"

    # Drop fraction should be roughly prob.
    drop_frac = float((y_np == 0.0).mean())
    assert abs(drop_frac - prob) < 0.08, f"drop fraction {drop_frac} far from {prob}"

    # Eval mode / prob=0 is identity; prob=1 is all zeros.
    y_eval = jax.block_until_ready(
        complex_dropout_real_format(x, seed=1234, prob=prob, training=False))
    assert bool((jax.device_get(y_eval) == x_np).all())
    y_p1 = jax.block_until_ready(
        complex_dropout_real_format(x, seed=1234, prob=1.0, training=True))
    assert bool((jax.device_get(y_p1) == 0.0).all())

    print("KERNEL_OK")
</pallas_src>

<mosaic_0001>
module attributes {stable_mosaic.version = 11 : i64} {
  func.func @_dropout_kernel(%arg0: i32, %arg1: memref<1xi32, #tpu.memory_space<smem>>, %arg2: memref<2x1024xf32, #tpu.memory_space<vmem>>, %arg3: memref<2x1024xf32, #tpu.memory_space<vmem>>) attributes {dimension_semantics = [#tpu.dimension_semantics<parallel>], iteration_bounds = array<i64: 1>, scalar_prefetch = 1 : i64, scratch_operands = 0 : i64, tpu.core_type = #tpu.core_type<tc>, window_params = [{transform_indices = @transform_0, window_bounds = array<i64: 2, 1024>}, {transform_indices = @transform_1, window_bounds = array<i64: 2, 1024>}]} {
    %c2_i32 = arith.constant 2 : i32
    %0 = arith.muli %arg0, %c2_i32 : i32
    %1 = tpu.iota {dimensions = array<i32: 0>} : vector<2x1024xi32>
    %2 = tpu.iota {dimensions = array<i32: 1>} : vector<2x1024xi32>
    %3 = vector.broadcast %0 : i32 to vector<2x1024xi32>
    %4 = arith.addi %3, %1 : vector<2x1024xi32>
    %c1024_i32 = arith.constant 1024 : i32
    %5 = vector.broadcast %c1024_i32 : i32 to vector<2x1024xi32>
    %6 = arith.muli %4, %5 : vector<2x1024xi32>
    %7 = arith.addi %6, %2 : vector<2x1024xi32>
    %c0 = arith.constant 0 : index
    %8 = memref.load %arg1[%c0] : memref<1xi32, #tpu.memory_space<smem>>
    %c-1640531527_i32 = arith.constant -1640531527 : i32
    %9 = arith.muli %8, %c-1640531527_i32 : i32
    %10 = vector.broadcast %9 : i32 to vector<2x1024xi32>
    %11 = arith.addi %7, %10 : vector<2x1024xi32>
    %c16_i32 = arith.constant 16 : i32
    %12 = vector.broadcast %c16_i32 : i32 to vector<2x1024xi32>
    %13 = arith.shrui %11, %12 : vector<2x1024xi32>
    %14 = arith.xori %11, %13 : vector<2x1024xi32>
    %c-2048144789_i32 = arith.constant -2048144789 : i32
    %15 = vector.broadcast %c-2048144789_i32 : i32 to vector<2x1024xi32>
    %16 = arith.muli %14, %15 : vector<2x1024xi32>
    %c13_i32 = arith.constant 13 : i32
    %17 = vector.broadcast %c13_i32 : i32 to vector<2x1024xi32>
    %18 = arith.shrui %16, %17 : vector<2x1024xi32>
    %19 = arith.xori %16, %18 : vector<2x1024xi32>
    %c-1028477387_i32 = arith.constant -1028477387 : i32
    %20 = vector.broadcast %c-1028477387_i32 : i32 to vector<2x1024xi32>
    %21 = arith.muli %19, %20 : vector<2x1024xi32>
    %c16_i32_0 = arith.constant 16 : i32
    %22 = vector.broadcast %c16_i32_0 : i32 to vector<2x1024xi32>
    %23 = arith.shrui %21, %22 : vector<2x1024xi32>
    %24 = arith.xori %21, %23 : vector<2x1024xi32>
    %c-2147483648_i32 = arith.constant -2147483648 : i32
    %25 = vector.broadcast %c-2147483648_i32 : i32 to vector<2x1024xi32>
    %26 = arith.cmpi uge, %24, %25 : vector<2x1024xi32>
    %c0_1 = arith.constant 0 : index
    %c0_2 = arith.constant 0 : index
    %27 = vector.load %arg2[%c0_1, %c0_2] : memref<2x1024xf32, #tpu.memory_space<vmem>>, vector<2x1024xf32>
    %cst = arith.constant 2.000000e+00 : f32
    %28 = vector.broadcast %cst : f32 to vector<2x1024xf32>
    %29 = arith.mulf %27, %28 : vector<2x1024xf32>
    %cst_3 = arith.constant 0.000000e+00 : f32
    %30 = vector.broadcast %cst_3 : f32 to vector<2x1024xf32>
    %31 = arith.select %26, %29, %30 : vector<2x1024xi1>, vector<2x1024xf32>
    %c0_4 = arith.constant 0 : index
    %c0_5 = arith.constant 0 : index
    %32 = vector.load %arg3[%c0_4, %c0_5] : memref<2x1024xf32, #tpu.memory_space<vmem>>, vector<2x1024xf32>
    tpu.vector_store %arg3[%c0_4, %c0_5], %31 {strides = array<i32>} : memref<2x1024xf32, #tpu.memory_space<vmem>>, vector<2x1024xf32>,
    return
  }
  func.func @transform_0(%arg0: i32, %arg1: memref<1xi32, #tpu.memory_space<smem>>) -> (i32, i32) {
    %c0_i32 = arith.constant 0 : i32
    %c0_i32_0 = arith.constant 0 : i32
    return %arg0, %c0_i32 : i32, i32
  }
  func.func @transform_1(%arg0: i32, %arg1: memref<1xi32, #tpu.memory_space<smem>>) -> (i32, i32) {
    %c0_i32 = arith.constant 0 : i32
    %c0_i32_0 = arith.constant 0 : i32
    return %arg0, %c0_i32 : i32, i32
  }
}

</mosaic_0001>

<bundles_post_ra>
// kernel: tpu_custom_call.1
= control target key start
LH: loop header
LB: loop body
LE: loop exit
PB: predicated region body
PF: predicated region fallthrough
CT: control target
= control target key end

     0   :  { %8 = vsyncpa [#allocation5], 0  ;;  %s340_s0 = inlined_call_operand.<no memory space> [shape: s32[1], index: 0, kind: input, shape index: {}]   ;;  %s341_s1 = inlined_call_operand.hbm [shape: f32[2,1024], index: 1, kind: input, shape index: {}]   ;;  %s342_s2 = inlined_call_operand.hbm [shape: f32[2,1024], index: 2, kind: output, shape index: {}]  }
   0x1   :  { %9 = vsyncpa [#allocation6], 0  ;;  %s293_s9 = smov [#allocation4]  }
   0x2   :  { %s16_s10 = sshll.u32 %s293_s9, 4  ;;  %s17_s10 = int_to_ptr.vmem [resolvable:$true] %s16_s10 }
   0x3   :  { %s257_s11 = scalar_lea.vmem %s17_s10, 256  ;;  %p262_p1 = scmp.lt.s32.totalorder %s17_s10, %s17_s10 }
   0x4   :  { %p258_p0 = scmp.ne.s32.totalorder %s17_s10, %s257_s11  ;;  %p263_p2 = scmp.lt.s32.totalorder %s257_s11, %s257_s11 }
   0x6   :  { %p264_p3 = por %p263_p2, %p262_p1 }
   0x8   :  { %p265_p4 = pnand %p264_p3, %p258_p0 }
   0xa   :  { %268 = shalt.err (!%p265_p4)
}
   0xb   :  { %19 = dma.hbm_to_vmem [thread:$0]  %s341_s1, 256, %s17_s10, [#allocation5]  }
   0xc   :  { %289 = dma.done.wait [#allocation5], 256  }
   0xd   :  { %290 = vsyncadd [#allocation5], 4294967040  ;;  %v24_v0 = vlaneseq  ;;  %s47_s16 = smul.u32 2654435769, %s340_s0  ;;  %v294_v1 = vmov 1983009808  }
   0xe   :  { %v137_v2 = vunpack.c.l.s4 %v294_v1  ;;  %v129_v19 = vld [vmem:[#allocation4] sm:$0xff]  ;;  %s295_s0 = smov [#allocation7]  }
   0xf   :  { %v25_v3 = vshrl.u32 %v24_v0, 7  ;;  %v27_v4 = vand.u32 127, %v24_v0  ;;  %v48_v5 = vstv %s47_s16  ;;  %v131_v28 = vmul.f32 2.0, %v129_v19  ;;  %s237_s1 = sshll.u32 %s295_s0, 4  ;;  %s238_s1 = int_to_ptr.vmem [resolvable:$true] %s237_s1 }
  0x10   :  { %v138_v6 = vunpack.c.0.s8 %v137_v2  ;;  %s269_s17 = scalar_lea.vmem %s238_s1, 256  ;;  %p274_p6 = scmp.lt.s32.totalorder %s238_s1, %s238_s1 }
  0x11   :  { %v28_v7 = vadd.s32 128, %v27_v4  ;;  %v29_v8 = vadd.s32 256, %v27_v4  ;;  %v30_v9 = vadd.s32 384, %v27_v4  ;;  %v37_v10 = vmul.u32 1024, %v25_v3  ;;  %p270_p5 = scmp.ne.s32.totalorder %s238_s1, %s269_s17  ;;  %p275_p7 = scmp.lt.s32.totalorder %s269_s17, %s269_s17 }
  0x12   :  { %v317_v11 = vsub.s32 %v138_v6, %v25_v3  ;;  %v31_v12 = vadd.s32 512, %v27_v4  ;;  %v32_v13 = vadd.s32 640, %v27_v4  ;;  %v33_v14 = vadd.s32 768, %v27_v4 }
  0x13   :  { %v38_v15 = vadd.s32 %v37_v10, %v27_v4  ;;  %v39_v16 = vadd.s32 %v37_v10, %v28_v7  ;;  %v40_v17 = vadd.s32 %v37_v10, %v29_v8  ;;  %v41_v18 = vadd.s32 %v37_v10, %v30_v9  ;;  %p276_p8 = por %p275_p7, %p274_p6 }
  0x14   :  { %v34_v20 = vadd.s32 896, %v27_v4  ;;  %v42_v21 = vadd.s32 %v37_v10, %v31_v12  ;;  %v43_v22 = vadd.s32 %v37_v10, %v32_v13  ;;  %v44_v23 = vadd.s32 %v37_v10, %v33_v14 }
  0x15   :  { %v49_v24 = vadd.s32 %v48_v5, %v38_v15  ;;  %v50_v25 = vadd.s32 %v48_v5, %v39_v16  ;;  %v51_v26 = vadd.s32 %v48_v5, %v40_v17  ;;  %v52_v27 = vadd.s32 %v48_v5, %v41_v18  ;;  %p277_p9 = pnand %p276_p8, %p270_p5 }
  0x16   :  { %v45_v29 = vadd.s32 %v37_v10, %v34_v20  ;;  %v53_v30 = vadd.s32 %v48_v5, %v42_v21  ;;  %v54_v31 = vadd.s32 %v48_v5, %v43_v22  ;;  %v135_v36 = vcombine.high %v131_v28, %v131_v28 }
  0x17   :  { %v57_v32 = vshrl.u32 %v49_v24, 16  ;;  %v58_v33 = vshrl.u32 %v50_v25, 16  ;;  %v59_v34 = vshrl.u32 %v51_v26, 16  ;;  %v60_v35 = vshrl.u32 %v52_v27, 16 }
  0x18   :  { %v320_v37 = vrot.slane %v131_v28, %v317_v11  ;;  %v55_v38 = vadd.s32 %v48_v5, %v44_v23  ;;  %v56_v39 = vadd.s32 %v48_v5, %v45_v29  ;;  %v323_v44 = vrot.slane %v135_v36, %v317_v11 }
  0x19   :  { %v65_v40 = vxor.u32 %v57_v32, %v49_v24  ;;  %v66_v41 = vxor.u32 %v58_v33, %v50_v25  ;;  %v67_v42 = vxor.u32 %v59_v34, %v51_v26  ;;  %v68_v43 = vxor.u32 %v60_v35, %v52_v27 }
  0x1a   :  { %v150_v45 = vcombine.high %v320_v37, %v320_v37  ;;  %v61_v46 = vshrl.u32 %v53_v30, 16  ;;  %v62_v47 = vshrl.u32 %v54_v31, 16  ;;  %v63_v50 = vshrl.u32 %v55_v38, 16 }
  0x1b   :  { %v73_v48 = vmul.u32 2246822507, %v65_v40  ;;  %v74_v49 = vmul.u32 2246822507, %v66_v41  ;;  %v64_v51 = vshrl.u32 %v56_v39, 16  ;;  %v151_v54 = vcombine.high %v323_v44, %v323_v44 }
  0x1c   :  { %v75_v52 = vmul.u32 2246822507, %v67_v42  ;;  %v76_v53 = vmul.u32 2246822507, %v68_v43  ;;  %v69_v55 = vxor.u32 %v61_v46, %v53_v30  ;;  %v70_v58 = vxor.u32 %v62_v47, %v54_v31 }
  0x1d   :  { %v81_v56 = vshrl.u32 %v73_v48, 13  ;;  %v82_v57 = vshrl.u32 %v74_v49, 13  ;;  %v71_v59 = vxor.u32 %v63_v50, %v55_v38  ;;  %v72_v62 = vxor.u32 %v64_v51, %v56_v39  ;;  %v130_v38 = vld [vmem:[#allocation4 + $0x8] sm:$0xff] }
  0x1e   :  { %v83_v60 = vshrl.u32 %v75_v52, 13  ;;  %v84_v61 = vshrl.u32 %v76_v53, 13  ;;  %v77_v63 = vmul.u32 2246822507, %v69_v55  ;;  %v78_v2 = vmul.u32 2246822507, %v70_v58 }
  0x1f   :  { %v89_v0 = vxor.u32 %v81_v56, %v73_v48  ;;  %v90_v1 = vxor.u32 %v82_v57, %v74_v49  ;;  %v79_v3 = vmul.u32 2246822507, %v71_v59  ;;  %v80_v6 = vmul.u32 2246822507, %v72_v62 }
  0x20   :  { %v91_v4 = vxor.u32 %v83_v60, %v75_v52  ;;  %v92_v5 = vxor.u32 %v84_v61, %v76_v53  ;;  %v85_v7 = vshrl.u32 %v77_v63, 13  ;;  %v86_v10 = vshrl.u32 %v78_v2, 13 }
  0x21   :  { %v97_v8 = vmul.u32 3266489909, %v89_v0  ;;  %v98_v9 = vmul.u32 3266489909, %v90_v1  ;;  %v87_v12 = vshrl.u32 %v79_v3, 13  ;;  %v88_v15 = vshrl.u32 %v80_v6, 13 }
  0x22   :  { %v99_v13 = vmul.u32 3266489909, %v91_v4  ;;  %v100_v14 = vmul.u32 3266489909, %v92_v5  ;;  %v93_v16 = vxor.u32 %v85_v7, %v77_v63  ;;  %v94_v19 = vxor.u32 %v86_v10, %v78_v2 }
  0x23   :  { %v105_v17 = vshrl.u32 %v97_v8, 16  ;;  %v106_v18 = vshrl.u32 %v98_v9, 16  ;;  %v95_v20 = vxor.u32 %v87_v12, %v79_v3  ;;  %v96_v23 = vxor.u32 %v88_v15, %v80_v6 }
  0x24   :  { %v107_v21 = vshrl.u32 %v99_v13, 16  ;;  %v108_v22 = vshrl.u32 %v100_v14, 16  ;;  %v101_v24 = vmul.u32 3266489909, %v93_v16  ;;  %v102_v27 = vmul.u32 3266489909, %v94_v19 }
  0x25   :  { %v113_v25 = vxor.u32 %v105_v17, %v97_v8  ;;  %v114_v26 = vxor.u32 %v106_v18, %v98_v9  ;;  %v103_v28 = vmul.u32 3266489909, %v95_v20  ;;  %v104_v31 = vmul.u32 3266489909, %v96_v23 }
  0x26   :  { %v115_v29 = vxor.u32 %v107_v21, %v99_v13  ;;  %v116_v30 = vxor.u32 %v108_v22, %v100_v14  ;;  %v109_v32 = vshrl.u32 %v101_v24, 16  ;;  %v110_v33 = vshrl.u32 %v102_v27, 16 }
  0x27   :  { %vm121_vm0 = vcmp.ge.u32.totalorder %v113_v25, 2147483648  ;;  %vm122_vm1 = vcmp.ge.u32.totalorder %v114_v26, 2147483648  ;;  %v111_v34 = vshrl.u32 %v103_v28, 16  ;;  %v112_v42 = vshrl.u32 %v104_v31, 16 }
  0x28   :  { %vm123_vm2 = vcmp.ge.u32.totalorder %v115_v29, 2147483648  ;;  %vm124_vm3 = vcmp.ge.u32.totalorder %v116_v30, 2147483648  ;;  %v177_v35 = vsel %vm121_vm0, %v320_v37, 0.0  ;;  %v178_v36 = vsel %vm122_vm1, %v150_v45, 0.0 }
  0x29   :  { %v179_v39 = vsel %vm123_vm2, %v323_v44, 0.0  ;;  %v180_v40 = vsel %vm124_vm3, %v151_v54, 0.0  ;;  %v193_v41 = vcombine.low %v177_v35, %v178_v36  ;;  %v117_v46 = vxor.u32 %v109_v32, %v101_v24 }
  0x2a   :  { %v194_v43 = vcombine.low %v179_v39, %v180_v40  ;;  %v118_v47 = vxor.u32 %v110_v33, %v102_v27  ;;  %v119_v48 = vxor.u32 %v111_v34, %v103_v28  ;;  %v132_v50 = vmul.f32 2.0, %v130_v38 }
  0x2b   :  { %v201_v49 = vrot.slane %v193_v41, %v317_v11  ;;  %v120_v52 = vxor.u32 %v112_v42, %v104_v31  ;;  %vm125_vm4 = vcmp.ge.u32.totalorder %v117_v46, 2147483648 }
  0x2c   :  { %v208_v51 = vrot.slane %v194_v43, %v317_v11  ;;  %v152_v53 = vcombine.high %v132_v50, %v132_v50  ;;  %v159_v37 = vrot.slane %v132_v50, %v317_v11  ;;  %vm126_vm5 = vcmp.ge.u32.totalorder %v118_v47, 2147483648 }
  0x2d   :  { %vm127_vm6 = vcmp.ge.u32.totalorder %v119_v48, 2147483648  ;;  %vm128_vm7 = vcmp.ge.u32.totalorder %v120_v52, 2147483648 }
  0x2e   :  { %v209_v45 = vcombine.low %v201_v49, %v208_v51  ;;  %v166_v44 = vrot.slane %v152_v53, %v317_v11  ;;  %v167_v54 = vcombine.high %v159_v37, %v159_v37  ;;  %v181_v55 = vsel %vm125_vm4, %v159_v37, 0.0 }
  0x30   :  { %229 = vst [vmem:[#allocation7] sm:$0xff] %v209_v45  ;;  %v168_v56 = vcombine.high %v166_v44, %v166_v44  ;;  %v182_v57 = vsel %vm126_vm5, %v167_v54, 0.0  ;;  %v183_v58 = vsel %vm127_vm6, %v166_v44, 0.0 }
  0x31   :  { %v210_v59 = vcombine.low %v181_v55, %v182_v57 }
  0x32   :  { %v184_v60 = vsel %vm128_vm7, %v168_v56, 0.0 }
  0x33   :  { %v211_v61 = vcombine.low %v183_v58, %v184_v60  ;;  %v218_v62 = vrot.slane %v210_v59, %v317_v11 }
  0x35   :  { %v225_v63 = vrot.slane %v211_v61, %v317_v11 }
  0x37   :  { %v226_v0 = vcombine.low %v218_v62, %v225_v63 }
  0x39   :  { %230 = vst [vmem:[#allocation7 + $0x8] sm:$0xff] %v226_v0 }
  0x3a   :  { %280 = shalt.err (!%p277_p9)
}
  0x3b   :  { %240 = dma.vmem_to_hbm [thread:$0]  %s238_s1, 256, %s342_s2, [#allocation6]  }
  0x3c   :  { %291 = dma.done.wait [#allocation6], 256  }
  0x3d   :  { %292 = vsyncadd [#allocation6], 4294967040 }
  0x3e   :  { %244 = vsyncpa [#allocation5], 1 }
  0x3f   :  { %245 = vsyncpa [#allocation6], 1 }

</bundles_post_ra>
